<compile_context>
chip_gen: v5e
topology: v5e:2x2
jax: 0.10.0
libtpu: 0.0.40
codegen_flags: <defaults>
</compile_context>

<pallas_src>
import jax
import jax.numpy as jnp
from jax.experimental import pallas as pl
from jax.experimental.pallas import tpu as pltpu


def _round_up(x, m):
    return (x + m - 1) // m * m


def _patch_embed_kernel(x_ref, w_ref, b_ref, o_ref):
    # x_ref: (TM, K) patch tile streamed from HBM.
    # w_ref: (K, Np) flattened conv weight, VMEM-resident (single-buffered).
    # b_ref: (1, Np) f32 bias, resident.
    # o_ref: (TM, Np) output tile; Np % 128 == 0 -> unmasked lane-dense stores.
    acc = jnp.dot(x_ref[...], w_ref[...], preferred_element_type=jnp.float32)
    o_ref[...] = (acc + b_ref[...]).astype(o_ref.dtype)


def patch_embedding(x, weight, bias, patch_size, *,
                    mxu_dtype=jnp.bfloat16, out_dtype=None, tm=1024):
    """Pallas TPU PatchEmbedding == Conv2d(k=s=P) -> flatten(2) -> transpose(1,2).

    x: (B, C, H, W); weight: (E, C, P, P); bias: (E,).
    Returns (B, num_patches, E).

    mxu_dtype: dtype of the MXU inputs (bf16 default — native on v5e/v6e/v7x;
               accumulation stays f32).  Pass None to keep x.dtype.
    out_dtype: output dtype (defaults to x.dtype; pass jnp.bfloat16 when the
               downstream transformer runs in bf16 to halve writeback traffic).
    tm:        row-tile size (patches per grid step).
    """
    B, C, H, W = x.shape
    E = weight.shape[0]
    P = patch_size
    Hp, Wp = H // P, W // P
    num_patches = Hp * Wp
    if out_dtype is None:
        out_dtype = x.dtype

    in_dtype = x.dtype if mxu_dtype is None else jnp.dtype(mxu_dtype)

    # --- glue: cast first, then patchify (non-overlapping stride==kernel conv)
    # (B, C, Hp, P, Wp, P) -> (B, Hp, Wp, C, P, P) -> (M, K)
    # TODO(synk): fuse this transpose into the kernel (grid over (B, Hp) row
    # bands, x in pl.ANY + manual strided DMA) to remove this extra HBM pass.
    xc = x.astype(in_dtype)
    xp = xc.reshape(B, C, Hp, P, Wp, P)
    xp = jnp.transpose(xp, (0, 2, 4, 1, 3, 5))
    xp = xp.reshape(B * num_patches, C * P * P)

    M, K = xp.shape
    N = E

    # Only the small weight/bias get padded (along N) for lane-dense stores;
    # the activation is used at its true (M, K) shape — no extra HBM copies.
    Np = _round_up(N, 128)
    w2d = weight.reshape(E, K).T.astype(in_dtype)       # (K, N), (c,i,j) order
    w_p = jnp.pad(w2d, ((0, 0), (0, Np - N))) if Np != N else w2d
    b2d = bias.astype(jnp.float32).reshape(1, N)
    b_p = jnp.pad(b2d, ((0, 0), (0, Np - N))) if Np != N else b2d

    # Row tile: multiple of 8 sublanes; ragged last block is write-masked.
    TM = min(tm, _round_up(M, 8))
    grid_m = pl.cdiv(M, TM)

    in_bytes = jnp.dtype(in_dtype).itemsize
    out_bytes = jnp.dtype(out_dtype).itemsize
    cost = pl.CostEstimate(
        flops=2 * M * K * Np,
        transcendentals=0,
        bytes_accessed=(M * K * in_bytes            # patches streamed once
                        + K * Np * in_bytes         # weight resident, once
                        + Np * 4                    # bias
                        + M * Np * out_bytes),      # output writeback
    )

    # VMEM working set: x/out double-buffered, weight/bias single-buffered.
    work = (2 * TM * K * in_bytes + K * Np * in_bytes + Np * 4
            + 2 * TM * Np * out_bytes)
    vmem_limit = None
    if work > (24 << 20):   # past v5e's 16 MiB / near 32 MiB default scopes
        vmem_limit = min(int(work * 5 // 4) + (4 << 20), 96 << 20)

    out = pl.pallas_call(
        _patch_embed_kernel,
        out_shape=jax.ShapeDtypeStruct((M, Np), out_dtype),
        grid_spec=pltpu.PrefetchScalarGridSpec(
            num_scalar_prefetch=0,
            grid=(grid_m,),
            in_specs=[
                pl.BlockSpec((TM, K), lambda i: (i, 0)),      # streamed patches
                pl.BlockSpec((K, Np), lambda i: (0, 0),
                             pipeline_mode=pl.Buffered(1)),   # resident weight
                pl.BlockSpec((1, Np), lambda i: (0, 0),
                             pipeline_mode=pl.Buffered(1)),   # resident bias
            ],
            out_specs=pl.BlockSpec((TM, Np), lambda i: (i, 0)),
        ),
        compiler_params=pltpu.CompilerParams(
            dimension_semantics=("parallel",),   # shard M across TCs on v7x
            vmem_limit_bytes=vmem_limit),
        cost_estimate=cost,
    )(xp, w_p, b_p)

    if Np != N:
        out = out[:, :N]
    return out.reshape(B, num_patches, E)


if __name__ == "__main__":
    # Small shapes consistent with the module's forward.
    B, C, H, W = 2, 4, 16, 16
    patch_size = 4
    embed_dim = 32
    num_patches = (H // patch_size) ** 2

    key = jax.random.PRNGKey(0)
    kx, kw, kb = jax.random.split(key, 3)
    x = jax.random.normal(kx, (B, C, H, W), dtype=jnp.float32)
    # Deterministic synthetic parameters (Conv2d weight/bias shapes).
    weight = jax.random.normal(
        kw, (embed_dim, C, patch_size, patch_size), dtype=jnp.float32) * 0.05
    bias = jax.random.normal(kb, (embed_dim,), dtype=jnp.float32) * 0.05

    # Reference: real strided conv + flatten + transpose (pure JAX/XLA).
    ref = jax.lax.conv_general_dilated(
        x, weight, window_strides=(patch_size, patch_size), padding="VALID",
        dimension_numbers=("NCHW", "OIHW", "NCHW"))
    ref = ref + bias[None, :, None, None]
    ref = ref.reshape(B, embed_dim, num_patches).transpose(0, 2, 1)

    # Default fast path: bf16 MXU inputs, f32 accumulation, f32 output.
    out_bf = jax.block_until_ready(patch_embedding(x, weight, bias, patch_size))
    assert out_bf.shape == (B, num_patches, embed_dim)
    assert jnp.allclose(out_bf, ref, atol=5e-2, rtol=5e-2)

    # f32 path: exact (within f32 reassociation) vs. the conv reference.
    out_f32 = jax.block_until_ready(
        patch_embedding(x, weight, bias, patch_size, mxu_dtype=None))
    assert out_f32.shape == (B, num_patches, embed_dim)
    assert jnp.allclose(out_f32, ref, atol=1e-4, rtol=1e-4)

    # bf16-output path (downstream bf16 transformer): halves writeback bytes.
    out_bfo = jax.block_until_ready(
        patch_embedding(x, weight, bias, patch_size, out_dtype=jnp.bfloat16))
    assert out_bfo.shape == (B, num_patches, embed_dim)
    assert out_bfo.dtype == jnp.bfloat16
    assert jnp.allclose(out_bfo.astype(jnp.float32), ref, atol=8e-2, rtol=8e-2)

    print("KERNEL_OK")
</pallas_src>

<mosaic_0001>
module attributes {stable_mosaic.version = 11 : i64} {
  func.func @_patch_embed_kernel(%arg0: i32, %arg1: memref<32x64xbf16, #tpu.memory_space<vmem>>, %arg2: memref<64x128xbf16, #tpu.memory_space<vmem>>, %arg3: memref<1x128xf32, #tpu.memory_space<vmem>>, %arg4: memref<32x128xf32, #tpu.memory_space<vmem>>) attributes {dimension_semantics = [#tpu.dimension_semantics<parallel>], iteration_bounds = array<i64: 1>, scalar_prefetch = 0 : i64, scratch_operands = 0 : i64, tpu.core_type = #tpu.core_type<tc>, window_params = [{transform_indices = @transform_0, window_bounds = array<i64: 32, 64>}, {pipeline_mode = #tpu.pipeline_mode<synchronous>, transform_indices = @transform_1, window_bounds = array<i64: 64, 128>}, {pipeline_mode = #tpu.pipeline_mode<synchronous>, transform_indices = @transform_2, window_bounds = array<i64: 1, 128>}, {transform_indices = @transform_3, window_bounds = array<i64: 32, 128>}]} {
    %c0 = arith.constant 0 : index
    %c0_0 = arith.constant 0 : index
    %0 = vector.load %arg1[%c0, %c0_0] : memref<32x64xbf16, #tpu.memory_space<vmem>>, vector<32x64xbf16>
    %c0_1 = arith.constant 0 : index
    %c0_2 = arith.constant 0 : index
    %1 = vector.load %arg2[%c0_1, %c0_2] : memref<64x128xbf16, #tpu.memory_space<vmem>>, vector<64x128xbf16>
    %cst = arith.constant dense<0.000000e+00> : vector<32x128xf32>
    %2 = tpu.matmul %0, %1, %cst {dimension_numbers = #tpu.dot_dimension_numbers<[1], [0], [0], [1], [0, 0, 1, 1], [], []>} : vector<32x64xbf16>, vector<64x128xbf16>, vector<32x128xf32> -> vector<32x128xf32>
    %c0_3 = arith.constant 0 : index
    %c0_4 = arith.constant 0 : index
    %3 = vector.load %arg3[%c0_3, %c0_4] : memref<1x128xf32, #tpu.memory_space<vmem>>, vector<1x128xf32>
    %4 = vector.broadcast %3 : vector<1x128xf32> to vector<32x128xf32>
    %5 = arith.addf %2, %4 : vector<32x128xf32>
    %c0_5 = arith.constant 0 : index
    %c0_6 = arith.constant 0 : index
    %6 = vector.load %arg4[%c0_5, %c0_6] : memref<32x128xf32, #tpu.memory_space<vmem>>, vector<32x128xf32>
    tpu.vector_store %arg4[%c0_5, %c0_6], %5 {strides = array<i32>} : memref<32x128xf32, #tpu.memory_space<vmem>>, vector<32x128xf32>,
    return
  }
  func.func @transform_0(%arg0: i32) -> (i32, i32) {
    %c0_i32 = arith.constant 0 : i32
    %c0_i32_0 = arith.constant 0 : i32
    return %arg0, %c0_i32 : i32, i32
  }
  func.func @transform_1(%arg0: i32) -> (i32, i32) {
    %c0_i32 = arith.constant 0 : i32
    %c0_i32_0 = arith.constant 0 : i32
    %c0_i32_1 = arith.constant 0 : i32
    return %c0_i32, %c0_i32_0 : i32, i32
  }
  func.func @transform_2(%arg0: i32) -> (i32, i32) {
    %c0_i32 = arith.constant 0 : i32
    %c0_i32_0 = arith.constant 0 : i32
    %c0_i32_1 = arith.constant 0 : i32
    return %c0_i32, %c0_i32_0 : i32, i32
  }
  func.func @transform_3(%arg0: i32) -> (i32, i32) {
    %c0_i32 = arith.constant 0 : i32
    %c0_i32_0 = arith.constant 0 : i32
    return %arg0, %c0_i32 : i32, i32
  }
}

</mosaic_0001>

<bundles_post_ra>
// kernel: tpu_custom_call.1
= control target key start
LH: loop header
LB: loop body
LE: loop exit
PB: predicated region body
PF: predicated region fallthrough
CT: control target
= control target key end

     0   :  { %8 = vsyncpa [#allocation3], 0  ;;  %s309_s0 = inlined_call_operand.hbm [shape: bf16[32,64], index: 0, kind: input, shape index: {}]   ;;  %s310_s1 = inlined_call_operand.hbm [shape: bf16[64,128], index: 1, kind: input, shape index: {}]   ;;  %s311_s2 = inlined_call_operand.vmem [shape: f32[1,128], index: 2, kind: input, shape index: {}]   ;;  %s312_s3 = inlined_call_operand.hbm [shape: f32[32,128], index: 3, kind: output, shape index: {}]  }
   0x1   :  { %9 = vsyncpa [#allocation6], 0 }
   0x2   :  { %10 = vsyncpa [#allocation4], 0  ;;  %s15_s14 = sshll.u32 %s309_s0, 4  ;;  %s270_s15 = smov [#allocation2]   ;;  %s16_s14 = int_to_ptr.hbm [resolvable:$true] %s15_s14 }
   0x3   :  { %s17_s16 = sshll.u32 %s270_s15, 4  ;;  %s28_s19 = sshll.u32 %s310_s1, 4  ;;  %s18_s16 = int_to_ptr.vmem [resolvable:$true] %s17_s16  ;;  %s29_s19 = int_to_ptr.hbm [resolvable:$true] %s28_s19 }
   0x4   :  { %s271_s20 = smov 64   ;;  %s272_s21 = smov 4  }
   0x5   :  { %23 = dma.hbm_to_vmem [thread:$0]  %s16_s14, 256, %s18_s16, [#allocation3], %s271_s20, %s271_s20, %s272_s21  }
   0x6   :  { %s273_s22 = smov [#allocation5]  }
   0x7   :  { %s30_s23 = sshll.u32 %s273_s22, 4  ;;  %s31_s23 = int_to_ptr.vmem [resolvable:$true] %s30_s23 }
   0x8   :  { %36 = dma.hbm_to_vmem [thread:$0]  %s29_s19, 512, %s31_s23, [#allocation6], %s271_s20, %s271_s20, %s272_s21  }
   0x9   :  { %264 = dma.done.wait [#allocation3], 256  }
   0xa   :  { %265 = vsyncadd [#allocation3], 4294967040 }
   0xb   :  { %266 = dma.done.wait [#allocation6], 512  }
   0xc   :  { %267 = vsyncadd [#allocation6], 4294966784  ;;  %v179_v0 = vld [vmem:[#allocation5 + $0x18] sm:$0xff]  ;;  %v178_v1 = vld [vmem:[#allocation5 + $0x10] sm:$0xff]  ;;  %vm98_vm0 = vcmask 523264   ;;  %s274_s24 = smov [#allocation7]  }
   0xd   :  { %109 = vmatpush.bf16.msra.mxu0 %v179_v0  ;;  %180 = vmatpush.bf16.msra.mxu1 %v179_v0  ;;  %v177_v2 = vld [vmem:[#allocation5 + $0x8] sm:$0xff]  ;;  %v176_v3 = vld [vmem:[#allocation5] sm:$0xff]  ;;  %v174_v4 = vld [vmem:[#allocation2] sm:$0xff]  ;;  %s132_s25 = sshll.u32 %s274_s24, 4  ;;  %s134_s28 = sshll.u32 %s312_s3, 4  ;;  %s133_s25 = int_to_ptr.vmem [resolvable:$true] %s132_s25  ;;  %s135_s28 = int_to_ptr.hbm [resolvable:$true] %s134_s28 }
   0xe   :  { %v175_v5 = vld [vmem:[#allocation2 + $0x8] sm:$0xff]  ;;  %v191_v6 = vld [vmem:[%s311_s2] ss:$0 sm:$0xff]  ;;  %s275_s2 = smov 128   ;;  %s276_s29 = smov 8  }
  0x11   :  { %110 = vmatpush.bf16.msra.mxu0 %v178_v1  ;;  %181 = vmatpush.bf16.msra.mxu1 %v178_v1 }
  0x15   :  { %111 = vmatpush.bf16.msra.mxu0 %v177_v2  ;;  %182 = vmatpush.bf16.msra.mxu1 %v177_v2 }
  0x19   :  { %112 = vmatpush.bf16.msra.mxu0 %v176_v3  ;;  %183 = vmatpush.bf16.msra.mxu1 %v176_v3 }
  0x1c   :  { %172 = vmatmul.msk.bf16.vlgmr.msra.gmra.mxu0 %vm98_vm0, %v174_v4  ;;  %173 = vmatmul.msk.bf16.vlgmr.msra.gmra.mxu1 %vm98_vm0, %v175_v5 }
  0x99   :  { %v114_v7 = vpop.f32.mrf.mxu0  ;;  %v119_v8 = vpop.f32.mrf.mxu1 }
  0x9a   :  { %v115_v9 = vadd.f32 %v191_v6, %v114_v7  ;;  %v120_v10 = vadd.f32 %v191_v6, %v119_v8 }
  0x9c   :  { %124 = vst [vmem:[#allocation7] sm:$0xff] %v115_v9 }
  0x9d   :  { %126 = vst [vmem:[#allocation7 + $0x10] sm:$0xff] %v120_v10 }
  0xa1   :  { %v116_v11 = vpop.f32.mrf.mxu0  ;;  %v121_v12 = vpop.f32.mrf.mxu1 }
  0xa2   :  { %v117_v13 = vadd.f32 %v191_v6, %v116_v11  ;;  %v122_v14 = vadd.f32 %v191_v6, %v121_v12 }
  0xa4   :  { %125 = vst [vmem:[#allocation7 + $0x8] sm:$0xff] %v117_v13 }
  0xa5   :  { %127 = vst [vmem:[#allocation7 + $0x18] sm:$0xff] %v122_v14 }
  0xa6   :  { %140 = dma.vmem_to_hbm [thread:$0]  %s133_s25, 512, %s135_s28, [#allocation4], %s275_s2, %s275_s2, %s276_s29  }
  0xa7   :  { %268 = dma.done.wait [#allocation4], 512  }
  0xa8   :  { %269 = vsyncadd [#allocation4], 4294966784 }
  0xa9   :  { %145 = vsyncpa [#allocation3], 1 }
  0xaa   :  { %146 = vsyncpa [#allocation6], 1 }
  0xab   :  { %147 = vsyncpa [#allocation4], 1 }

</bundles_post_ra>
